<compile_context>
chip_gen: v5e
topology: v5e:2x2
jax: 0.10.0
libtpu: 0.0.40
codegen_flags: <defaults>
</compile_context>

<pallas_src>
import functools

import jax
import jax.numpy as jnp
from jax import lax
from jax.experimental import pallas as pl
from jax.experimental.pallas import tpu as pltpu


def _mish(v):
    # x * tanh(softplus(x)), numerically stable softplus
    sp = jnp.maximum(v, 0.0) + jnp.log(1.0 + jnp.exp(-jnp.abs(v)))
    return v * jnp.tanh(sp)


def _sep_conv_block_kernel(x_ref, dw_ref, pw_ref, pwb_ref, gamma_ref, beta_ref,
                           out_ref, xpad_ref, conv_ref, sum_ref, ssq_ref,
                           *, N, H, W, Cin, Cout, eps, norm, activation):
    L = H * W
    PAD = W + 1                       # covers |dy*W + dx| <= W + 1
    n = pl.program_id(0)

    # ---- stage this batch's input into a flat zero-padded VMEM scratch ----
    xpad_ref[:, :PAD] = jnp.zeros((Cin, PAD), jnp.float32)
    xpad_ref[:, PAD + L:] = jnp.zeros((Cin, PAD), jnp.float32)
    xpad_ref[:, PAD:PAD + L] = x_ref[0].astype(jnp.float32)

    # column (w-direction) validity masks — the only edges the flat pad can't catch
    lane = lax.broadcasted_iota(jnp.int32, (1, L), 1)
    w_idx = lane % W
    col_mask = {-1: w_idx > 0, 0: None, 1: w_idx < (W - 1)}

    # ---- depthwise 3x3, stride 1, "same": 9 lane-dense VPU MACs ----
    acc = jnp.zeros((Cin, L), jnp.float32)
    for dy in (-1, 0, 1):
        for dx in (-1, 0, 1):
            k = 3 * (dy + 1) + (dx + 1)
            off = dy * W + dx
            tap = xpad_ref[:, PAD + off:PAD + off + L]          # (Cin, L)
            if col_mask[dx] is not None:
                tap = jnp.where(col_mask[dx], tap, 0.0)
            acc = acc + tap * dw_ref[k].astype(jnp.float32)     # dw_ref[k]: (Cin, 1)

    # ---- pointwise 1x1: Cin broadcast MACs on the VPU (MXU near-empty at C=4) ----
    y = jnp.zeros((Cout, L), jnp.float32)
    for ci in range(Cin):
        y = y + pw_ref[ci].astype(jnp.float32) * acc[ci:ci + 1, :]   # (Cout,1)*(1,L)
    y = y + pwb_ref[...].astype(jnp.float32)                          # + bias (Cout,1)

    if norm:
        # training-mode BatchNorm2d: biased stats over the full (N, H, W) extent.
        @pl.when(n == 0)
        def _():
            sum_ref[...] = jnp.zeros_like(sum_ref)
            ssq_ref[...] = jnp.zeros_like(ssq_ref)

        conv_ref[n] = y                                   # keep un-normalized result
        sum_ref[...] += jnp.sum(y, axis=1, keepdims=True)
        ssq_ref[...] += jnp.sum(y * y, axis=1, keepdims=True)

        @pl.when(n == N - 1)
        def _():
            inv_cnt = 1.0 / float(N * L)
            mean = sum_ref[...] * inv_cnt                 # (Cout, 1)
            var = ssq_ref[...] * inv_cnt - mean * mean
            scale = gamma_ref[...].astype(jnp.float32) * lax.rsqrt(var + eps)
            shift = beta_ref[...].astype(jnp.float32) - mean * scale
            z = conv_ref[...] * scale[None] + shift[None]  # (N, Cout, L)
            if activation:
                z = _mish(z)
            out_ref[...] = z.astype(out_ref.dtype)
    else:
        z = y
        if activation:
            z = _mish(z)
        out_ref[0] = z.astype(out_ref.dtype)


def separable_conv_block(x_nchw, params, *, norm=True, activation=False, eps=1e-3):
    """x_nchw: [N, Cin, H, W] (PyTorch layout). Returns [N, Cout, H, W]."""
    N, Cin, H, W = x_nchw.shape
    dw = params["dw"]          # [3, 3, Cin]   depthwise weight (per-channel 3x3)
    pw = params["pw"]          # [Cin, Cout]   pointwise weight
    pwb = params["pwb"]        # [Cout]        pointwise bias
    gamma = params["gamma"]    # [Cout]
    beta = params["beta"]      # [Cout]
    Cout = pw.shape[1]
    L = H * W
    PAD = W + 1

    # Free, contiguous reshapes only — no transposes / pads in HBM.
    x_flat = x_nchw.reshape(N, Cin, L)
    dw_r = dw.reshape(9, Cin)[:, :, None]        # (9, Cin, 1) — k = ky*3 + kx
    pw_r = pw[:, :, None]                        # (Cin, Cout, 1)
    pwb_r = pwb[:, None]                         # (Cout, 1)
    gamma_r = gamma[:, None]
    beta_r = beta[:, None]

    kernel = functools.partial(
        _sep_conv_block_kernel,
        N=N, H=H, W=W, Cin=Cin, Cout=Cout,
        eps=eps, norm=norm, activation=activation,
    )

    if norm:
        # Output stays VMEM-resident across the batch grid; the BN finalize on the
        # last step normalizes + writes it back fused (no extra HBM round trip).
        out_spec = pl.BlockSpec((N, Cout, L), lambda n: (0, 0, 0))
        dim_sem = ("arbitrary",)      # batch axis is the BN reduction axis
    else:
        out_spec = pl.BlockSpec((1, Cout, L), lambda n: (n, 0, 0))
        dim_sem = ("parallel",)       # independent per batch -> megacore-shardable

    out_flat = pl.pallas_call(
        kernel,
        out_shape=jax.ShapeDtypeStruct((N, Cout, L), x_nchw.dtype),
        grid_spec=pltpu.PrefetchScalarGridSpec(
            num_scalar_prefetch=0,
            grid=(N,),
            in_specs=[
                pl.BlockSpec((1, Cin, L), lambda n: (n, 0, 0)),      # x
                pl.BlockSpec((9, Cin, 1), lambda n: (0, 0, 0)),      # dw
                pl.BlockSpec((Cin, Cout, 1), lambda n: (0, 0, 0)),   # pw
                pl.BlockSpec((Cout, 1), lambda n: (0, 0)),           # pw bias
                pl.BlockSpec((Cout, 1), lambda n: (0, 0)),           # gamma
                pl.BlockSpec((Cout, 1), lambda n: (0, 0)),           # beta
            ],
            out_specs=out_spec,
            scratch_shapes=[
                pltpu.VMEM((Cin, L + 2 * PAD), jnp.float32),   # flat padded input
                pltpu.VMEM((N, Cout, L), jnp.float32),         # un-normalized conv
                pltpu.VMEM((Cout, 1), jnp.float32),            # BN sum
                pltpu.VMEM((Cout, 1), jnp.float32),            # BN sum of squares
            ],
        ),
        compiler_params=pltpu.CompilerParams(
            dimension_semantics=dim_sem,
            vmem_limit_bytes=32 * 1024 * 1024,   # explicit, v7x-safe (usage ~tens of KiB)
        ),
    )(x_flat, dw_r, pw_r, pwb_r, gamma_r, beta_r)

    return out_flat.reshape(N, Cout, H, W)       # free reshape back to NCHW


def _reference(x_nchw, params, *, norm=True, activation=False, eps=1e-3):
    """Pure-JAX reference (lax convs) mirroring the PyTorch forward."""
    N, Cin, H, W = x_nchw.shape
    dw, pw, pwb = params["dw"], params["pw"], params["pwb"]
    gamma, beta = params["gamma"], params["beta"]

    dw_oihw = jnp.transpose(dw, (2, 0, 1))[:, None, :, :]        # [Cin,1,3,3]
    y = lax.conv_general_dilated(
        x_nchw, dw_oihw, window_strides=(1, 1), padding=((1, 1), (1, 1)),
        dimension_numbers=("NCHW", "OIHW", "NCHW"), feature_group_count=Cin)
    pw_oihw = jnp.transpose(pw, (1, 0))[:, :, None, None]        # [Cout,Cin,1,1]
    y = lax.conv_general_dilated(
        y, pw_oihw, window_strides=(1, 1), padding=((0, 0), (0, 0)),
        dimension_numbers=("NCHW", "OIHW", "NCHW"))
    y = y + pwb[None, :, None, None]
    if norm:
        mean = jnp.mean(y, axis=(0, 2, 3), keepdims=True)
        var = jnp.mean((y - mean) ** 2, axis=(0, 2, 3), keepdims=True)
        y = (y - mean) * lax.rsqrt(var + eps)
        y = y * gamma[None, :, None, None] + beta[None, :, None, None]
    if activation:
        y = y * jnp.tanh(jax.nn.softplus(y))
    return y


if __name__ == "__main__":
    N, Cin, Cout, H, W = 2, 4, 4, 16, 16

    key = jax.random.PRNGKey(0)
    kx, kdw, kpw, kpb, kg, kb = jax.random.split(key, 6)

    x = jax.random.normal(kx, (N, Cin, H, W), dtype=jnp.float32)
    params = {
        "dw": 0.2 * jax.random.normal(kdw, (3, 3, Cin), dtype=jnp.float32),
        "pw": 0.2 * jax.random.normal(kpw, (Cin, Cout), dtype=jnp.float32),
        "pwb": 0.1 * jax.random.normal(kpb, (Cout,), dtype=jnp.float32),
        "gamma": 1.0 + 0.1 * jax.random.normal(kg, (Cout,), dtype=jnp.float32),
        "beta": 0.1 * jax.random.normal(kb, (Cout,), dtype=jnp.float32),
    }

    for norm, act in [(True, False), (True, True), (False, True)]:
        out = jax.block_until_ready(
            separable_conv_block(x, params, norm=norm, activation=act))
        ref = jax.block_until_ready(
            _reference(x, params, norm=norm, activation=act))
        assert out.shape == (N, Cout, H, W)
        err = float(jnp.max(jnp.abs(out - ref)))
        assert err < 1e-4, f"mismatch vs reference (norm={norm}, act={act}): {err}"

    print("KERNEL_OK")
</pallas_src>

<mosaic_0001>
module attributes {stable_mosaic.version = 11 : i64} {
  func.func @_sep_conv_block_kernel(%arg0: i32, %arg1: memref<1x4x256xf32, #tpu.memory_space<vmem>>, %arg2: memref<9x4x1xf32, #tpu.memory_space<vmem>>, %arg3: memref<4x4x1xf32, #tpu.memory_space<vmem>>, %arg4: memref<4x1xf32, #tpu.memory_space<vmem>>, %arg5: memref<4x1xf32, #tpu.memory_space<vmem>>, %arg6: memref<4x1xf32, #tpu.memory_space<vmem>>, %arg7: memref<2x4x256xf32, #tpu.memory_space<vmem>>, %arg8: memref<4x290xf32, #tpu.memory_space<vmem>>, %arg9: memref<2x4x256xf32, #tpu.memory_space<vmem>>, %arg10: memref<4x1xf32, #tpu.memory_space<vmem>>, %arg11: memref<4x1xf32, #tpu.memory_space<vmem>>) attributes {dimension_semantics = [#tpu.dimension_semantics<arbitrary>], iteration_bounds = array<i64: 2>, scalar_prefetch = 0 : i64, scratch_operands = 4 : i64, tpu.core_type = #tpu.core_type<tc>, window_params = [{transform_indices = @transform_0, window_bounds = array<i64: 1, 4, 256>}, {pipeline_mode = #tpu.pipeline_mode<synchronous>, transform_indices = @transform_1, window_bounds = array<i64: 9, 4, 1>}, {pipeline_mode = #tpu.pipeline_mode<synchronous>, transform_indices = @transform_2, window_bounds = array<i64: 4, 4, 1>}, {pipeline_mode = #tpu.pipeline_mode<synchronous>, transform_indices = @transform_3, window_bounds = array<i64: 4, 1>}, {pipeline_mode = #tpu.pipeline_mode<synchronous>, transform_indices = @transform_4, window_bounds = array<i64: 4, 1>}, {pipeline_mode = #tpu.pipeline_mode<synchronous>, transform_indices = @transform_5, window_bounds = array<i64: 4, 1>}, {pipeline_mode = #tpu.pipeline_mode<synchronous>, transform_indices = @transform_6, window_bounds = array<i64: 2, 4, 256>}]} {
    %cst = arith.constant 0.000000e+00 : f32
    %0 = vector.broadcast %cst : f32 to vector<4x17xf32>
    %c0 = arith.constant 0 : index
    %c0_0 = arith.constant 0 : index
    %1 = vector.load %arg8[%c0, %c0_0] : memref<4x290xf32, #tpu.memory_space<vmem>>, vector<4x17xf32>
    tpu.vector_store %arg8[%c0, %c0_0], %0 {strides = array<i32>} : memref<4x290xf32, #tpu.memory_space<vmem>>, vector<4x17xf32>,
    %cst_1 = arith.constant 0.000000e+00 : f32
    %2 = vector.broadcast %cst_1 : f32 to vector<4x17xf32>
    %c0_2 = arith.constant 0 : index
    %c273 = arith.constant 273 : index
    %3 = vector.load %arg8[%c0_2, %c273] : memref<4x290xf32, #tpu.memory_space<vmem>>, vector<4x17xf32>
    tpu.vector_store %arg8[%c0_2, %c273], %2 {strides = array<i32>} : memref<4x290xf32, #tpu.memory_space<vmem>>, vector<4x17xf32>,
    %c0_3 = arith.constant 0 : index
    %c0_4 = arith.constant 0 : index
    %c0_5 = arith.constant 0 : index
    %4 = vector.load %arg1[%c0_3, %c0_4, %c0_5] : memref<1x4x256xf32, #tpu.memory_space<vmem>>, vector<1x4x256xf32>
    %5 = vector.shape_cast %4 : vector<1x4x256xf32> to vector<4x256xf32>
    %c0_6 = arith.constant 0 : index
    %c17 = arith.constant 17 : index
    %6 = vector.load %arg8[%c0_6, %c17] : memref<4x290xf32, #tpu.memory_space<vmem>>, vector<4x256xf32>
    tpu.vector_store %arg8[%c0_6, %c17], %5 {strides = array<i32>} : memref<4x290xf32, #tpu.memory_space<vmem>>, vector<4x256xf32>,
    %7 = tpu.iota {dimensions = array<i32: 1>} : vector<1x256xi32>
    %c16_i32 = arith.constant 16 : i32
    %c0_i32 = arith.constant 0 : i32
    %8 = arith.cmpi eq, %c16_i32, %c0_i32 : i32
    %c1_i32 = arith.constant 1 : i32
    %9 = arith.select %8, %c1_i32, %c16_i32 : i32
    %10 = vector.broadcast %9 : i32 to vector<1x256xi32>
    %11 = arith.remsi %7, %10 : vector<1x256xi32>
    %c0_i32_7 = arith.constant 0 : i32
    %12 = vector.broadcast %c0_i32_7 : i32 to vector<1x256xi32>
    %13 = arith.cmpi ne, %11, %12 : vector<1x256xi32>
    %c0_i32_8 = arith.constant 0 : i32
    %14 = vector.broadcast %c0_i32_8 : i32 to vector<1x256xi32>
    %15 = arith.cmpi slt, %11, %14 : vector<1x256xi32>
    %c0_i32_9 = arith.constant 0 : i32
    %16 = arith.cmpi slt, %9, %c0_i32_9 : i32
    %17 = vector.broadcast %16 : i1 to vector<1x256xi1>
    %18 = vector.broadcast %17 : vector<1x256xi1> to vector<1x256xi1>
    %19 = arith.xori %15, %18 : vector<1x256xi1>
    %20 = arith.andi %19, %13 : vector<1x256xi1>
    %21 = vector.broadcast %9 : i32 to vector<1x256xi32>
    %22 = arith.addi %11, %21 : vector<1x256xi32>
    %23 = arith.select %20, %22, %11 : vector<1x256xi1>, vector<1x256xi32>
    %c0_i32_10 = arith.constant 0 : i32
    %24 = vector.broadcast %c0_i32_10 : i32 to vector<1x256xi32>
    %25 = arith.cmpi sgt, %23, %24 : vector<1x256xi32>
    %c15_i32 = arith.constant 15 : i32
    %26 = vector.broadcast %c15_i32 : i32 to vector<1x256xi32>
    %27 = arith.cmpi slt, %23, %26 : vector<1x256xi32>
    %cst_11 = arith.constant 0.000000e+00 : f32
    %28 = vector.broadcast %cst_11 : f32 to vector<4x256xf32>
    %c0_12 = arith.constant 0 : index
    %c0_13 = arith.constant 0 : index
    %29 = vector.load %arg8[%c0_12, %c0_13] : memref<4x290xf32, #tpu.memory_space<vmem>>, vector<4x256xf32>
    %cst_14 = arith.constant 0.000000e+00 : f32
    %30 = vector.shape_cast %25 : vector<1x256xi1> to vector<1x256xi1>
    %31 = vector.broadcast %30 : vector<1x256xi1> to vector<4x256xi1>
    %32 = vector.broadcast %cst_14 : f32 to vector<4x256xf32>
    %33 = arith.select %31, %29, %32 : vector<4x256xi1>, vector<4x256xf32>
    %c0_15 = arith.constant 0 : index
    %c0_16 = arith.constant 0 : index
    %c0_17 = arith.constant 0 : index
    %34 = vector.load %arg2[%c0_15, %c0_16, %c0_17] : memref<9x4x1xf32, #tpu.memory_space<vmem>>, vector<1x4x1xf32>
    %35 = vector.shape_cast %34 : vector<1x4x1xf32> to vector<4x1xf32>
    %36 = vector.broadcast %35 : vector<4x1xf32> to vector<4x256xf32>
    %37 = arith.mulf %33, %36 : vector<4x256xf32>
    %38 = arith.addf %28, %37 : vector<4x256xf32>
    %c0_18 = arith.constant 0 : index
    %c1 = arith.constant 1 : index
    %39 = vector.load %arg8[%c0_18, %c1] : memref<4x290xf32, #tpu.memory_space<vmem>>, vector<4x256xf32>
    %c1_19 = arith.constant 1 : index
    %c0_20 = arith.constant 0 : index
    %c0_21 = arith.constant 0 : index
    %40 = vector.load %arg2[%c1_19, %c0_20, %c0_21] : memref<9x4x1xf32, #tpu.memory_space<vmem>>, vector<1x4x1xf32>
    %41 = vector.shape_cast %40 : vector<1x4x1xf32> to vector<4x1xf32>
    %42 = vector.broadcast %41 : vector<4x1xf32> to vector<4x256xf32>
    %43 = arith.mulf %39, %42 : vector<4x256xf32>
    %44 = arith.addf %38, %43 : vector<4x256xf32>
    %c0_22 = arith.constant 0 : index
    %c2 = arith.constant 2 : index
    %45 = vector.load %arg8[%c0_22, %c2] : memref<4x290xf32, #tpu.memory_space<vmem>>, vector<4x256xf32>
    %cst_23 = arith.constant 0.000000e+00 : f32
    %46 = vector.shape_cast %27 : vector<1x256xi1> to vector<1x256xi1>
    %47 = vector.broadcast %46 : vector<1x256xi1> to vector<4x256xi1>
    %48 = vector.broadcast %cst_23 : f32 to vector<4x256xf32>
    %49 = arith.select %47, %45, %48 : vector<4x256xi1>, vector<4x256xf32>
    %c2_24 = arith.constant 2 : index
    %c0_25 = arith.constant 0 : index
    %c0_26 = arith.constant 0 : index
    %50 = vector.load %arg2[%c2_24, %c0_25, %c0_26] : memref<9x4x1xf32, #tpu.memory_space<vmem>>, vector<1x4x1xf32>
    %51 = vector.shape_cast %50 : vector<1x4x1xf32> to vector<4x1xf32>
    %52 = vector.broadcast %51 : vector<4x1xf32> to vector<4x256xf32>
    %53 = arith.mulf %49, %52 : vector<4x256xf32>
    %54 = arith.addf %44, %53 : vector<4x256xf32>
    %c0_27 = arith.constant 0 : index
    %c16 = arith.constant 16 : index
    %55 = vector.load %arg8[%c0_27, %c16] : memref<4x290xf32, #tpu.memory_space<vmem>>, vector<4x256xf32>
    %cst_28 = arith.constant 0.000000e+00 : f32
    %56 = vector.shape_cast %25 : vector<1x256xi1> to vector<1x256xi1>
    %57 = vector.broadcast %56 : vector<1x256xi1> to vector<4x256xi1>
    %58 = vector.broadcast %cst_28 : f32 to vector<4x256xf32>
    %59 = arith.select %57, %55, %58 : vector<4x256xi1>, vector<4x256xf32>
    %c3 = arith.constant 3 : index
    %c0_29 = arith.constant 0 : index
    %c0_30 = arith.constant 0 : index
    %60 = vector.load %arg2[%c3, %c0_29, %c0_30] : memref<9x4x1xf32, #tpu.memory_space<vmem>>, vector<1x4x1xf32>
    %61 = vector.shape_cast %60 : vector<1x4x1xf32> to vector<4x1xf32>
    %62 = vector.broadcast %61 : vector<4x1xf32> to vector<4x256xf32>
    %63 = arith.mulf %59, %62 : vector<4x256xf32>
    %64 = arith.addf %54, %63 : vector<4x256xf32>
    %c0_31 = arith.constant 0 : index
    %c17_32 = arith.constant 17 : index
    %65 = vector.load %arg8[%c0_31, %c17_32] : memref<4x290xf32, #tpu.memory_space<vmem>>, vector<4x256xf32>
    %c4 = arith.constant 4 : index
    %c0_33 = arith.constant 0 : index
    %c0_34 = arith.constant 0 : index
    %66 = vector.load %arg2[%c4, %c0_33, %c0_34] : memref<9x4x1xf32, #tpu.memory_space<vmem>>, vector<1x4x1xf32>
    %67 = vector.shape_cast %66 : vector<1x4x1xf32> to vector<4x1xf32>
    %68 = vector.broadcast %67 : vector<4x1xf32> to vector<4x256xf32>
    %69 = arith.mulf %65, %68 : vector<4x256xf32>
    %70 = arith.addf %64, %69 : vector<4x256xf32>
    %c0_35 = arith.constant 0 : index
    %c18 = arith.constant 18 : index
    %71 = vector.load %arg8[%c0_35, %c18] : memref<4x290xf32, #tpu.memory_space<vmem>>, vector<4x256xf32>
    %cst_36 = arith.constant 0.000000e+00 : f32
    %72 = vector.shape_cast %27 : vector<1x256xi1> to vector<1x256xi1>
    %73 = vector.broadcast %72 : vector<1x256xi1> to vector<4x256xi1>
    %74 = vector.broadcast %cst_36 : f32 to vector<4x256xf32>
    %75 = arith.select %73, %71, %74 : vector<4x256xi1>, vector<4x256xf32>
    %c5 = arith.constant 5 : index
    %c0_37 = arith.constant 0 : index
    %c0_38 = arith.constant 0 : index
    %76 = vector.load %arg2[%c5, %c0_37, %c0_38] : memref<9x4x1xf32, #tpu.memory_space<vmem>>, vector<1x4x1xf32>
    %77 = vector.shape_cast %76 : vector<1x4x1xf32> to vector<4x1xf32>
    %78 = vector.broadcast %77 : vector<4x1xf32> to vector<4x256xf32>
    %79 = arith.mulf %75, %78 : vector<4x256xf32>
    %80 = arith.addf %70, %79 : vector<4x256xf32>
    %c0_39 = arith.constant 0 : index
    %c32 = arith.constant 32 : index
    %81 = vector.load %arg8[%c0_39, %c32] : memref<4x290xf32, #tpu.memory_space<vmem>>, vector<4x256xf32>
    %cst_40 = arith.constant 0.000000e+00 : f32
    %82 = vector.shape_cast %25 : vector<1x256xi1> to vector<1x256xi1>
    %83 = vector.broadcast %82 : vector<1x256xi1> to vector<4x256xi1>
    %84 = vector.broadcast %cst_40 : f32 to vector<4x256xf32>
    %85 = arith.select %83, %81, %84 : vector<4x256xi1>, vector<4x256xf32>
    %c6 = arith.constant 6 : index
    %c0_41 = arith.constant 0 : index
    %c0_42 = arith.constant 0 : index
    %86 = vector.load %arg2[%c6, %c0_41, %c0_42] : memref<9x4x1xf32, #tpu.memory_space<vmem>>, vector<1x4x1xf32>
    %87 = vector.shape_cast %86 : vector<1x4x1xf32> to vector<4x1xf32>
    %88 = vector.broadcast %87 : vector<4x1xf32> to vector<4x256xf32>
    %89 = arith.mulf %85, %88 : vector<4x256xf32>
    %90 = arith.addf %80, %89 : vector<4x256xf32>
    %c0_43 = arith.constant 0 : index
    %c33 = arith.constant 33 : index
    %91 = vector.load %arg8[%c0_43, %c33] : memref<4x290xf32, #tpu.memory_space<vmem>>, vector<4x256xf32>
    %c7 = arith.constant 7 : index
    %c0_44 = arith.constant 0 : index
    %c0_45 = arith.constant 0 : index
    %92 = vector.load %arg2[%c7, %c0_44, %c0_45] : memref<9x4x1xf32, #tpu.memory_space<vmem>>, vector<1x4x1xf32>
    %93 = vector.shape_cast %92 : vector<1x4x1xf32> to vector<4x1xf32>
    %94 = vector.broadcast %93 : vector<4x1xf32> to vector<4x256xf32>
    %95 = arith.mulf %91, %94 : vector<4x256xf32>
    %96 = arith.addf %90, %95 : vector<4x256xf32>
    %c0_46 = arith.constant 0 : index
    %c34 = arith.constant 34 : index
    %97 = vector.load %arg8[%c0_46, %c34] : memref<4x290xf32, #tpu.memory_space<vmem>>, vector<4x256xf32>
    %cst_47 = arith.constant 0.000000e+00 : f32
    %98 = vector.shape_cast %27 : vector<1x256xi1> to vector<1x256xi1>
    %99 = vector.broadcast %98 : vector<1x256xi1> to vector<4x256xi1>
    %100 = vector.broadcast %cst_47 : f32 to vector<4x256xf32>
    %101 = arith.select %99, %97, %100 : vector<4x256xi1>, vector<4x256xf32>
    %c8 = arith.constant 8 : index
    %c0_48 = arith.constant 0 : index
    %c0_49 = arith.constant 0 : index
    %102 = vector.load %arg2[%c8, %c0_48, %c0_49] : memref<9x4x1xf32, #tpu.memory_space<vmem>>, vector<1x4x1xf32>
    %103 = vector.shape_cast %102 : vector<1x4x1xf32> to vector<4x1xf32>
    %104 = vector.broadcast %103 : vector<4x1xf32> to vector<4x256xf32>
    %105 = arith.mulf %101, %104 : vector<4x256xf32>
    %106 = arith.addf %96, %105 : vector<4x256xf32>
    %cst_50 = arith.constant 0.000000e+00 : f32
    %107 = vector.broadcast %cst_50 : f32 to vector<4x256xf32>
    %c0_51 = arith.constant 0 : index
    %c0_52 = arith.constant 0 : index
    %c0_53 = arith.constant 0 : index
    %108 = vector.load %arg3[%c0_51, %c0_52, %c0_53] : memref<4x4x1xf32, #tpu.memory_space<vmem>>, vector<1x4x1xf32>
    %109 = vector.shape_cast %108 : vector<1x4x1xf32> to vector<4x1xf32>
    %110 = vector.extract_strided_slice %106 {offsets = [0, 0], sizes = [1, 256], strides = [1, 1]} : vector<4x256xf32> to vector<1x256xf32>
    %111 = vector.broadcast %109 : vector<4x1xf32> to vector<4x256xf32>
    %112 = vector.broadcast %110 : vector<1x256xf32> to vector<4x256xf32>
    %113 = arith.mulf %111, %112 : vector<4x256xf32>
    %114 = arith.addf %107, %113 : vector<4x256xf32>
    %c1_54 = arith.constant 1 : index
    %c0_55 = arith.constant 0 : index
    %c0_56 = arith.constant 0 : index
    %115 = vector.load %arg3[%c1_54, %c0_55, %c0_56] : memref<4x4x1xf32, #tpu.memory_space<vmem>>, vector<1x4x1xf32>
    %116 = vector.shape_cast %115 : vector<1x4x1xf32> to vector<4x1xf32>
    %117 = vector.extract_strided_slice %106 {offsets = [1, 0], sizes = [1, 256], strides = [1, 1]} : vector<4x256xf32> to vector<1x256xf32>
    %118 = vector.broadcast %116 : vector<4x1xf32> to vector<4x256xf32>
    %119 = vector.broadcast %117 : vector<1x256xf32> to vector<4x256xf32>
    %120 = arith.mulf %118, %119 : vector<4x256xf32>
    %121 = arith.addf %114, %120 : vector<4x256xf32>
    %c2_57 = arith.constant 2 : index
    %c0_58 = arith.constant 0 : index
    %c0_59 = arith.constant 0 : index
    %122 = vector.load %arg3[%c2_57, %c0_58, %c0_59] : memref<4x4x1xf32, #tpu.memory_space<vmem>>, vector<1x4x1xf32>
    %123 = vector.shape_cast %122 : vector<1x4x1xf32> to vector<4x1xf32>
    %124 = vector.extract_strided_slice %106 {offsets = [2, 0], sizes = [1, 256], strides = [1, 1]} : vector<4x256xf32> to vector<1x256xf32>
    %125 = vector.broadcast %123 : vector<4x1xf32> to vector<4x256xf32>
    %126 = vector.broadcast %124 : vector<1x256xf32> to vector<4x256xf32>
    %127 = arith.mulf %125, %126 : vector<4x256xf32>
    %128 = arith.addf %121, %127 : vector<4x256xf32>
    %c3_60 = arith.constant 3 : index
    %c0_61 = arith.constant 0 : index
    %c0_62 = arith.constant 0 : index
    %129 = vector.load %arg3[%c3_60, %c0_61, %c0_62] : memref<4x4x1xf32, #tpu.memory_space<vmem>>, vector<1x4x1xf32>
    %130 = vector.shape_cast %129 : vector<1x4x1xf32> to vector<4x1xf32>
    %131 = vector.extract_strided_slice %106 {offsets = [3, 0], sizes = [1, 256], strides = [1, 1]} : vector<4x256xf32> to vector<1x256xf32>
    %132 = vector.broadcast %130 : vector<4x1xf32> to vector<4x256xf32>
    %133 = vector.broadcast %131 : vector<1x256xf32> to vector<4x256xf32>
    %134 = arith.mulf %132, %133 : vector<4x256xf32>
    %135 = arith.addf %128, %134 : vector<4x256xf32>
    %c0_63 = arith.constant 0 : index
    %c0_64 = arith.constant 0 : index
    %136 = vector.load %arg4[%c0_63, %c0_64] : memref<4x1xf32, #tpu.memory_space<vmem>>, vector<4x1xf32>
    %137 = vector.broadcast %136 : vector<4x1xf32> to vector<4x256xf32>
    %138 = arith.addf %135, %137 : vector<4x256xf32>
    %c0_i32_65 = arith.constant 0 : i32
    %139 = arith.cmpi eq, %arg0, %c0_i32_65 : i32
    %140 = arith.extui %139 : i1 to i32
    %c0_i32_66 = arith.constant 0 : i32
    %141 = arith.cmpi ne, %140, %c0_i32_66 : i32
    scf.if %141 {
      %cst_81 = arith.constant 0.000000e+00 : f32
      %160 = vector.broadcast %cst_81 : f32 to vector<4x1xf32>
      %c0_82 = arith.constant 0 : index
      %c0_83 = arith.constant 0 : index
      %161 = vector.load %arg10[%c0_82, %c0_83] : memref<4x1xf32, #tpu.memory_space<vmem>>, vector<4x1xf32>
      tpu.vector_store %arg10[%c0_82, %c0_83], %160 {strides = array<i32>} : memref<4x1xf32, #tpu.memory_space<vmem>>, vector<4x1xf32>,
      %cst_84 = arith.constant 0.000000e+00 : f32
      %162 = vector.broadcast %cst_84 : f32 to vector<4x1xf32>
      %c0_85 = arith.constant 0 : index
      %c0_86 = arith.constant 0 : index
      %163 = vector.load %arg11[%c0_85, %c0_86] : memref<4x1xf32, #tpu.memory_space<vmem>>, vector<4x1xf32>
      tpu.vector_store %arg11[%c0_85, %c0_86], %162 {strides = array<i32>} : memref<4x1xf32, #tpu.memory_space<vmem>>, vector<4x1xf32>,
    } else {
    }
    %142 = arith.index_cast %arg0 : i32 to index
    %c0_67 = arith.constant 0 : index
    %c0_68 = arith.constant 0 : index
    %143 = vector.load %arg9[%142, %c0_67, %c0_68] : memref<2x4x256xf32, #tpu.memory_space<vmem>>, vector<1x4x256xf32>
    %144 = vector.shape_cast %143 : vector<1x4x256xf32> to vector<4x256xf32>
    %145 = vector.shape_cast %138 : vector<4x256xf32> to vector<1x4x256xf32>
    tpu.vector_store %arg9[%142, %c0_67, %c0_68], %145 {strides = array<i32>} : memref<2x4x256xf32, #tpu.memory_space<vmem>>, vector<1x4x256xf32>,
    %c0_69 = arith.constant 0 : index
    %c0_70 = arith.constant 0 : index
    %146 = vector.load %arg10[%c0_69, %c0_70] : memref<4x1xf32, #tpu.memory_space<vmem>>, vector<4x1xf32>
    %cst_71 = arith.constant dense<0.000000e+00> : vector<4xf32>
    %147 = vector.multi_reduction <add>, %138, %cst_71 [1] : vector<4x256xf32> to vector<4xf32>
    %148 = vector.shape_cast %147 : vector<4xf32> to vector<4x1xf32>
    %149 = arith.addf %146, %148 : vector<4x1xf32>
    %c0_72 = arith.constant 0 : index
    %c0_73 = arith.constant 0 : index
    %150 = vector.load %arg10[%c0_72, %c0_73] : memref<4x1xf32, #tpu.memory_space<vmem>>, vector<4x1xf32>
    tpu.vector_store %arg10[%c0_72, %c0_73], %149 {strides = array<i32>} : memref<4x1xf32, #tpu.memory_space<vmem>>, vector<4x1xf32>,
    %c0_74 = arith.constant 0 : index
    %c0_75 = arith.constant 0 : index
    %151 = vector.load %arg11[%c0_74, %c0_75] : memref<4x1xf32, #tpu.memory_space<vmem>>, vector<4x1xf32>
    %152 = arith.mulf %138, %138 : vector<4x256xf32>
    %cst_76 = arith.constant dense<0.000000e+00> : vector<4xf32>
    %153 = vector.multi_reduction <add>, %152, %cst_76 [1] : vector<4x256xf32> to vector<4xf32>
    %154 = vector.shape_cast %153 : vector<4xf32> to vector<4x1xf32>
    %155 = arith.addf %151, %154 : vector<4x1xf32>
    %c0_77 = arith.constant 0 : index
    %c0_78 = arith.constant 0 : index
    %156 = vector.load %arg11[%c0_77, %c0_78] : memref<4x1xf32, #tpu.memory_space<vmem>>, vector<4x1xf32>
    tpu.vector_store %arg11[%c0_77, %c0_78], %155 {strides = array<i32>} : memref<4x1xf32, #tpu.memory_space<vmem>>, vector<4x1xf32>,
    %c1_i32_79 = arith.constant 1 : i32
    %157 = arith.cmpi eq, %arg0, %c1_i32_79 : i32
    %158 = arith.extui %157 : i1 to i32
    %c0_i32_80 = arith.constant 0 : i32
    %159 = arith.cmpi ne, %158, %c0_i32_80 : i32
    scf.if %159 {
      %c0_81 = arith.constant 0 : index
      %c0_82 = arith.constant 0 : index
      %160 = vector.load %arg10[%c0_81, %c0_82] : memref<4x1xf32, #tpu.memory_space<vmem>>, vector<4x1xf32>
      %cst_83 = arith.constant 0.001953125 : f32
      %161 = vector.broadcast %cst_83 : f32 to vector<4x1xf32>
      %162 = arith.mulf %160, %161 : vector<4x1xf32>
      %c0_84 = arith.constant 0 : index
      %c0_85 = arith.constant 0 : index
      %163 = vector.load %arg11[%c0_84, %c0_85] : memref<4x1xf32, #tpu.memory_space<vmem>>, vector<4x1xf32>
      %cst_86 = arith.constant 0.001953125 : f32
      %164 = vector.broadcast %cst_86 : f32 to vector<4x1xf32>
      %165 = arith.mulf %163, %164 : vector<4x1xf32>
      %166 = arith.mulf %162, %162 : vector<4x1xf32>
      %167 = arith.subf %165, %166 : vector<4x1xf32>
      %c0_87 = arith.constant 0 : index
      %c0_88 = arith.constant 0 : index
      %168 = vector.load %arg5[%c0_87, %c0_88] : memref<4x1xf32, #tpu.memory_space<vmem>>, vector<4x1xf32>
      %cst_89 = arith.constant 1.000000e-03 : f32
      %169 = vector.broadcast %cst_89 : f32 to vector<4x1xf32>
      %170 = arith.addf %167, %169 : vector<4x1xf32>
      %171 = math.rsqrt %170 : vector<4x1xf32>
      %172 = arith.mulf %168, %171 : vector<4x1xf32>
      %c0_90 = arith.constant 0 : index
      %c0_91 = arith.constant 0 : index
      %173 = vector.load %arg6[%c0_90, %c0_91] : memref<4x1xf32, #tpu.memory_space<vmem>>, vector<4x1xf32>
      %174 = arith.mulf %162, %172 : vector<4x1xf32>
      %175 = arith.subf %173, %174 : vector<4x1xf32>
      %c0_92 = arith.constant 0 : index
      %c0_93 = arith.constant 0 : index
      %c0_94 = arith.constant 0 : index
      %176 = vector.load %arg9[%c0_92, %c0_93, %c0_94] : memref<2x4x256xf32, #tpu.memory_space<vmem>>, vector<2x4x256xf32>
      %177 = vector.shape_cast %172 : vector<4x1xf32> to vector<1x4x1xf32>
      %178 = vector.broadcast %177 : vector<1x4x1xf32> to vector<2x4x256xf32>
      %179 = arith.mulf %176, %178 : vector<2x4x256xf32>
      %180 = vector.shape_cast %175 : vector<4x1xf32> to vector<1x4x1xf32>
      %181 = vector.broadcast %180 : vector<1x4x1xf32> to vector<2x4x256xf32>
      %182 = arith.addf %179, %181 : vector<2x4x256xf32>
      %c0_95 = arith.constant 0 : index
      %c0_96 = arith.constant 0 : index
      %c0_97 = arith.constant 0 : index
      %183 = vector.load %arg7[%c0_95, %c0_96, %c0_97] : memref<2x4x256xf32, #tpu.memory_space<vmem>>, vector<2x4x256xf32>
      tpu.vector_store %arg7[%c0_95, %c0_96, %c0_97], %182 {strides = array<i32>} : memref<2x4x256xf32, #tpu.memory_space<vmem>>, vector<2x4x256xf32>,
    } else {
    }
    return
  }
  func.func @transform_0(%arg0: i32) -> (i32, i32, i32) {
    %c0_i32 = arith.constant 0 : i32
    %c0_i32_0 = arith.constant 0 : i32
    %c0_i32_1 = arith.constant 0 : i32
    return %arg0, %c0_i32, %c0_i32_0 : i32, i32, i32
  }
  func.func @transform_1(%arg0: i32) -> (i32, i32, i32) {
    %c0_i32 = arith.constant 0 : i32
    %c0_i32_0 = arith.constant 0 : i32
    %c0_i32_1 = arith.constant 0 : i32
    %c0_i32_2 = arith.constant 0 : i32
    return %c0_i32, %c0_i32_0, %c0_i32_1 : i32, i32, i32
  }
  func.func @transform_2(%arg0: i32) -> (i32, i32, i32) {
    %c0_i32 = arith.constant 0 : i32
    %c0_i32_0 = arith.constant 0 : i32
    %c0_i32_1 = arith.constant 0 : i32
    %c0_i32_2 = arith.constant 0 : i32
    return %c0_i32, %c0_i32_0, %c0_i32_1 : i32, i32, i32
  }
  func.func @transform_3(%arg0: i32) -> (i32, i32) {
    %c0_i32 = arith.constant 0 : i32
    %c0_i32_0 = arith.constant 0 : i32
    %c0_i32_1 = arith.constant 0 : i32
    return %c0_i32, %c0_i32_0 : i32, i32
  }
  func.func @transform_4(%arg0: i32) -> (i32, i32) {
    %c0_i32 = arith.constant 0 : i32
    %c0_i32_0 = arith.constant 0 : i32
    %c0_i32_1 = arith.constant 0 : i32
    return %c0_i32, %c0_i32_0 : i32, i32
  }
  func.func @transform_5(%arg0: i32) -> (i32, i32) {
    %c0_i32 = arith.constant 0 : i32
    %c0_i32_0 = arith.constant 0 : i32
    %c0_i32_1 = arith.constant 0 : i32
    return %c0_i32, %c0_i32_0 : i32, i32
  }
  func.func @transform_6(%arg0: i32) -> (i32, i32, i32) {
    %c0_i32 = arith.constant 0 : i32
    %c0_i32_0 = arith.constant 0 : i32
    %c0_i32_1 = arith.constant 0 : i32
    %c0_i32_2 = arith.constant 0 : i32
    return %c0_i32, %c0_i32_0, %c0_i32_1 : i32, i32, i32
  }
}

</mosaic_0001>

<bundles_post_ra>
// kernel: tpu_custom_call.1
= control target key start
LH: loop header
LB: loop body
LE: loop exit
PB: predicated region body
PF: predicated region fallthrough
CT: control target
= control target key end

     0   :  { %11 = vsyncpa [#allocation7], 0  ;;  %s947_s21 = smov 0   ;;  %s1094_s0 = inlined_call_operand.vmem [shape: f32[2,4,256], index: 0, kind: input, shape index: {}]   ;;  %s1095_s1 = inlined_call_operand.vmem [shape: f32[9,4,1], index: 1, kind: input, shape index: {}]   ;;  %s1096_s2 = inlined_call_operand.vmem [shape: f32[4,4,1], index: 2, kind: input, shape index: {}]   ;;  %s1097_s3 = inlined_call_operand.vmem [shape: f32[4,1], index: 3, kind: input, shape index: {}]   ;;  %s1098_s4 = inlined_call_operand.vmem [shape: f32[4,1], index: 4, kind: input, shape index: {}]   ;;  %s1099_s5 = inlined_call_operand.vmem [shape: f32[4,1], index: 5, kind: input, shape index: {}]   ;;  %s1100_s6 = inlined_call_operand.hbm [shape: f32[2,4,256], index: 6, kind: output, shape index: {}]  }
   0x1 LB: > { %s953_s22 = sadd.s32 4294967295, %s893_s21   ;;  %p794_p0 = scmp.ge.s32.totalorder %s893_s21, 1  ;;  %s893_s21 = sphi %s947_s21, %s17_s21  }
   0x2   : > { %p208_p1 = scmp.lt.s32.totalorder %s893_s21, 3 }
   0x4   : > { %p209_p2 = pnand %p794_p0, %p208_p1 }
   0x5   : > { %p233_p3 = scmp.lt.s32.totalorder (!%p209_p2), %s953_s22, 1  ;;  %s897_s8 = smov (!%p209_p2), 17  }
   0x6   : > { %212 = sbr.rel (%p209_p2) target bundleno = 655 (0x28f), region = 44  ;;  %s899_s23 = smov (!%p209_p2), 127  }
   0x7   : > { %s900_s24 = smov (!%p209_p2), 126   ;;  %s902_s26 = smov (!%p209_p2), 111  }
   0x8   : > { %s903_s27 = smov (!%p209_p2), 110   ;;  %s905_s29 = smov (!%p209_p2), 95  }
   0x9   : > { %s906_s30 = smov (!%p209_p2), 94   ;;  %p808_p4 = scmp.ne.s32.totalorder (!%p209_p2), %s953_s22, 0 }
   0xb   : > { %vm238_vm0 = vcmask 134144   ;;  %v895_v0 = vmov 0   ;;  %v300_v1 = vld [vmem:[%s1095_s1] sm:$0xf]  ;;  %s234_s25 = scalar_select %p233_p3, %s953_s22, 1  ;;  %v896_v3 = vmov 0.0  }
   0xc   : > { %849 = vset.pattern.permute.xlu0 %v895_v0  ;;  %850 = vset.pattern.permute.xlu1 %v895_v0  ;;  %v800_v2 = vld [vmem:[%s1095_s1 + $0x10] sm:$0xf]  ;;  %239 = vst.msk [vmem:[#allocation2] sm:$0xf] %vm238_vm0, %v896_v3  ;;  %vm240_vm1 = vcmask 273544   ;;  %vm251_vm2 = vcmask 1043592  }
   0xd   : > { %303 = vperm.xlu1 %850, %v300_v1   ;;  %851 = vset.pattern.permute.xlu2 %v895_v0  ;;  %s816_s28 = sshll.u32 %s234_s25, 3  ;;  %241 = vst.msk [vmem:[#allocation2 + $0x8] sm:$0xf] %vm240_vm1, %v896_v3  ;;  %v798_v5 = vld [vmem:[%s1095_s1 + $0x8] sm:$0xf]  ;;  %vm252_vm3 = vcmask 1047556  }
   0xe   : > { %424 = vperm.xlu2 %851, %v800_v2   ;;  %s237_s7 = scalar_lea.vmem %s1094_s0, %s816_s28  ;;  %v797_v6 = vld [vmem:[%s1095_s1 + $0x4] sm:$0xf]  ;;  %v801_v7 = vld [vmem:[%s1095_s1 + $0x14] sm:$0xf]  ;;  %v803_v8 = vld [vmem:[%s1095_s1 + $0x1c] sm:$0xf] }
   0xf   : > { %v242_v4 = vld [vmem:[%s237_s7] sm:$0xff]  ;;  %v802_v9 = vld [vmem:[%s1095_s1 + $0x18] sm:$0xf]  ;;  %v799_v10 = vld [vmem:[%s1095_s1 + $0xc] sm:$0xf]  ;;  %vm247_vm4 = vcmask 138240  }
  0x10   : > { %244 = vrot.lane.b32.xlu0 %v242_v4, %s897_s8  ;;  %vm253_vm5 = vmor %vm252_vm3, %vm251_vm2  ;;  %v898_v13 = vmov 839922192   ;;  %s901_s25 = smov 112   ;;  %s904_s28 = smov 96   ;;  %v805_v0 = vld [vmem:[%s1096_s2 + $0x4] sm:$0xf] }
  0x11   : > { %v319_v14 = vunpack.c.l.s4 %v898_v13  ;;  %v592_v1 = vld [vmem:[%s1096_s2] sm:$0xf]  ;;  %v807_v4 = vld [vmem:[%s1096_s2 + $0xc] sm:$0xf]  ;;  %vm339_vm8 = vcmask 1039360   ;;  %vm366_vm9 = vcmask 1031168  }
  0x12   : > { %v804_v2 = vld [vmem:[%s1095_s1 + $0x20] sm:$0xf]  ;;  %vm400_vm12 = vcmask 916480   ;;  %vm447_vm13 = vcmask 908288   ;;  %vm470_vm14 = vcmask 900096   ;;  %vm504_vm15 = vcmask 785408  }
  0x13   : > { %v988_v16 = vunpack.c.0.s8 %v319_v14  ;;  %v643_v3 = vld [vmem:[%s1097_s3] sm:$0xf]  ;;  %vm551_vm1 = vcmask 777216  }
  0x15   : > { %411 = vperm.xlu1 %850, %v799_v10  }
  0x16   : > { %377 = vperm.xlu2 %851, %v798_v5   ;;  %v806_v5 = vld [vmem:[%s1096_s2 + $0x8] sm:$0xf] }
  0x18   : > { %316 = vperm.xlu0 %849, %v797_v6  }
  0x1e   : > { %481 = vperm.xlu2 %851, %v801_v7  }
  0x20   : > { %528 = vperm.xlu0 %849, %v803_v8  }
  0x28   : > { %515 = vperm.xlu0 %849, %v802_v9  }
  0x68   : > { %v425_v30 = vpop.permute.xlu2 %424 }
  0x69   : > { %v429_v32 = vperm.slane %v425_v30, %v988_v16 }
  0x70   : > { %v378_v6 = vpop.permute.xlu2 %377 }
  0x78   : > { %v1026_v8 = vpop.permute.xlu2 %481 }
  0x7f   : > { %v304_v7 = vpop.permute.xlu1 %303 }
  0x82   : > { %v245_v11 = vpop.permute.xlu0 %244 }
  0x83   : > { %v246_v12 = vrot.slane %v245_v11, 4 }
  0x85   : > { %v248_v15 = vsel %vm247_vm4, %v246_v12, %v245_v11  ;;  %255 = vst.msk [vmem:[#allocation2 + $0x8] sm:$0xf] %vm238_vm0, %v246_v12  ;;  %v256_v11 = vlaneseq  ;;  %vm574_vm0 = vcmask 769024  }
  0x86   : > { %254 = vst.msk [vmem:[#allocation2] sm:$0xff] %vm253_vm5, %v248_v15 }
  0x87   : > { %v412_v10 = vpop.permute.xlu1 %411  ;;  %v257_v12 = vand.u32 127, %v256_v11 }
  0x89   : > { %v258_v15 = vadd.s32 128, %v257_v12 }
  0x8a   : > { %v317_v17 = vpop.permute.xlu0 %316 }
  0x8b   : > { %v321_v18 = vperm.slane %v317_v17, %v988_v16  ;;  %v263_v17 = vand.u32 15, %v257_v12 }
  0x8c   : > { %v311_v19 = vld [vmem:[#allocation2 + $0x8] sm:$0xf] }
  0x8d   : > { %v991_v20 = vld [vmem:[#allocation2] sm:$0xff]  ;;  %v324_v21 = vmul.f32 %v321_v18, %v311_v19  ;;  %v347_v22 = vld [vmem:[#allocation2 + $0x8] sm:$0xf]  ;;  %vm1030_vm6 = vcmp.gt.s32.totalorder %v263_v17, 0  ;;  %vm1044_vm10 = vcmp.lt.s32.totalorder %v263_v17, 15 }
  0x8e   : > { %293 = vst [vmem:[#allocation1] ss:$2 sm:$0xff] %v991_v20  ;;  %v323_v23 = vmul.f32 %v991_v20, %v321_v18  ;;  %v385_v27 = vld [vmem:[#allocation2 + $0x8] sm:$0xf]  ;;  %v431_v38 = vmul.f32 %v429_v32, %v991_v20  ;;  %v270_v18 = vand.u32 15, %v258_v15 }
  0x8f   : > { %329 = vst [vmem:[#allocation1 + $0x10] ss:$2 sm:$0xff] %v324_v21  ;;  %v419_v33 = vld [vmem:[#allocation2 + $0x8] sm:$0xf] }
  0x90   : > { %v432_v34 = vmul.f32 %v429_v32, %v419_v33  ;;  %v455_v39 = vld [vmem:[#allocation2 + $0x8] sm:$0xf]  ;;  %vm1034_vm7 = vcmp.gt.s32.totalorder %v270_v18, 0  ;;  %vm1048_vm11 = vcmp.lt.s32.totalorder %v270_v18, 15 }
  0x91   : > { %v489_v43 = vld [vmem:[#allocation2 + $0x8] sm:$0xf] }
  0x92   : > { %v529_v46 = vpop.permute.xlu0 %528  ;;  %v523_v49 = vld [vmem:[#allocation2 + $0x8] sm:$0xf] }
  0x93   : > { %v533_v48 = vperm.slane %v529_v46, %v988_v16  ;;  %v559_v54 = vld [vmem:[#allocation2 + $0x8] sm:$0xf] }
  0x95   : > { %v995_v24 = vld.sshfl [vmem:[#allocation1] sm:$0xff pattern:$0x75316420]  ;;  %v997_v25 = vld.sshfl [vmem:[#allocation1 + $0x8] sm:$0xff pattern:$0x75316420]  ;;  %v536_v50 = vmul.f32 %v533_v48, %v523_v49  ;;  %v535_v55 = vmul.f32 %v533_v48, %v991_v20 }
  0x96   : > { %327 = vst [vmem:[#allocation1] ss:$2 sm:$0xff] %v323_v23  ;;  %v332_v26 = vld.sshfl [vmem:[#allocation1 + $0x10] sm:$0xff pattern:$0x75316420] }
  0x97   : > { %356 = vst [vmem:[#allocation1 + $0x10] ss:$2 sm:$0xff] %v347_v22  ;;  %337 = vrot.lane.b32.xlu1 %v332_v26, %s899_s23  ;;  %v298_v26 = vsel %vm1030_vm6, %v995_v24, 0.0 }
  0x98   : > { %v306_v32 = vmul.f32 %v304_v7, %v298_v26 }
  0x9a   : > { %v1028_v19 = vpop.permute.xlu0 %515 }
  0x9d   : > { %v331_v28 = vld.sshfl [vmem:[#allocation1 + $0x8] sm:$0xff pattern:$0x75316420]  ;;  %v330_v29 = vld.sshfl [vmem:[#allocation1] sm:$0xff pattern:$0x75316420] }
  0x9e   : > { %v359_v31 = vld.sshfl [vmem:[#allocation1 + $0x10] sm:$0xff pattern:$0x75316420]  ;;  %335 = vrot.lane.b32.xlu2 %v331_v28, %s899_s23  ;;  %354 = vst [vmem:[#allocation1] ss:$2 sm:$0xff] %v991_v20 }
  0x9f   : > { %390 = vst [vmem:[#allocation1 + $0x10] ss:$2 sm:$0xff] %v385_v27  ;;  %333 = vrot.lane.b32.xlu1 %v330_v29, %s899_s23  ;;  %v299_v27 = vsel %vm1034_vm7, %v997_v25, 0.0 }
  0xa5   : > { %v358_v35 = vld.sshfl [vmem:[#allocation1 + $0x8] sm:$0xff pattern:$0x75316420]  ;;  %v357_v36 = vld.sshfl [vmem:[#allocation1] sm:$0xff pattern:$0x75316420] }
  0xa6   : > { %362 = vrot.lane.b32.xlu0 %v358_v35, %s900_s24  ;;  %360 = vrot.lane.b32.xlu2 %v357_v36, %s900_s24  ;;  %388 = vst [vmem:[#allocation1] ss:$2 sm:$0xff] %v991_v20  ;;  %v393_v37 = vld.sshfl [vmem:[#allocation1 + $0x10] sm:$0xff pattern:$0x75316420]  ;;  %v307_v35 = vmul.f32 %v304_v7, %v299_v27 }
  0xa7   : > { %364 = vrot.lane.b32.xlu1 %v359_v31, %s900_s24  ;;  %437 = vst [vmem:[#allocation1 + $0x10] ss:$2 sm:$0xff] %v432_v34 }
  0xad   : > { %v392_v40 = vld.sshfl [vmem:[#allocation1 + $0x8] sm:$0xff pattern:$0x75316420]  ;;  %v391_v41 = vld.sshfl [vmem:[#allocation1] sm:$0xff pattern:$0x75316420] }
  0xae   : > { %398 = vrot.lane.b32.xlu0 %v393_v37, %s901_s25  ;;  %396 = vrot.lane.b32.xlu2 %v392_v40, %s901_s25  ;;  %435 = vst [vmem:[#allocation1] ss:$2 sm:$0xff] %v431_v38  ;;  %v440_v42 = vld.sshfl [vmem:[#allocation1 + $0x10] sm:$0xff pattern:$0x75316420] }
  0xaf   : > { %394 = vrot.lane.b32.xlu1 %v391_v41, %s901_s25  ;;  %460 = vst [vmem:[#allocation1 + $0x10] ss:$2 sm:$0xff] %v455_v39 }
  0xb5   : > { %v439_v44 = vld.sshfl [vmem:[#allocation1 + $0x8] sm:$0xff pattern:$0x75316420]  ;;  %v438_v45 = vld.sshfl [vmem:[#allocation1] sm:$0xff pattern:$0x75316420] }
  0xb6   : > { %443 = vrot.lane.b32.xlu0 %v439_v44, %s902_s26  ;;  %441 = vrot.lane.b32.xlu2 %v438_v45, %s902_s26  ;;  %458 = vst [vmem:[#allocation1] ss:$2 sm:$0xff] %v991_v20  ;;  %v463_v47 = vld.sshfl [vmem:[#allocation1 + $0x10] sm:$0xff pattern:$0x75316420] }
  0xb7   : > { %445 = vrot.lane.b32.xlu1 %v440_v42, %s902_s26  ;;  %494 = vst [vmem:[#allocation1 + $0x10] ss:$2 sm:$0xff] %v489_v43 }
  0xbd   : > { %v462_v51 = vld.sshfl [vmem:[#allocation1 + $0x8] sm:$0xff pattern:$0x75316420]  ;;  %v461_v52 = vld.sshfl [vmem:[#allocation1] sm:$0xff pattern:$0x75316420] }
  0xbe   : > { %466 = vrot.lane.b32.xlu0 %v462_v51, %s903_s27  ;;  %464 = vrot.lane.b32.xlu2 %v461_v52, %s903_s27  ;;  %492 = vst [vmem:[#allocation1] ss:$2 sm:$0xff] %v991_v20  ;;  %v497_v53 = vld.sshfl [vmem:[#allocation1 + $0x10] sm:$0xff pattern:$0x75316420] }
  0xbf   : > { %468 = vrot.lane.b32.xlu1 %v463_v47, %s903_s27  ;;  %541 = vst [vmem:[#allocation1 + $0x10] ss:$2 sm:$0xff] %v536_v50 }
  0xc5   : > { %v495_v56 = vld.sshfl [vmem:[#allocation1] sm:$0xff pattern:$0x75316420]  ;;  %v496_v57 = vld.sshfl [vmem:[#allocation1 + $0x8] sm:$0xff pattern:$0x75316420] }
  0xc6   : > { %502 = vrot.lane.b32.xlu2 %v497_v53, %s904_s28  ;;  %498 = vrot.lane.b32.xlu0 %v495_v56, %s904_s28  ;;  %539 = vst [vmem:[#allocation1] ss:$2 sm:$0xff] %v535_v55  ;;  %v544_v58 = vld.sshfl [vmem:[#allocation1 + $0x10] sm:$0xff pattern:$0x75316420] }
  0xc7   : > { %500 = vrot.lane.b32.xlu1 %v496_v57, %s904_s28  ;;  %564 = vst [vmem:[#allocation1 + $0x10] ss:$2 sm:$0xff] %v559_v54 }
  0xcd   : > { %v543_v59 = vld.sshfl [vmem:[#allocation1 + $0x8] sm:$0xff pattern:$0x75316420]  ;;  %v542_v60 = vld.sshfl [vmem:[#allocation1] sm:$0xff pattern:$0x75316420] }
  0xce   : > { %549 = vrot.lane.b32.xlu0 %v544_v58, %s905_s29  ;;  %547 = vrot.lane.b32.xlu2 %v543_v59, %s905_s29  ;;  %562 = vst [vmem:[#allocation1] ss:$2 sm:$0xff] %v991_v20  ;;  %v567_v61 = vld.sshfl [vmem:[#allocation1 + $0x10] sm:$0xff pattern:$0x75316420] }
  0xcf   : > { %545 = vrot.lane.b32.xlu1 %v542_v60, %s905_s29 }
  0xd5   : > { %v566_v62 = vld.sshfl [vmem:[#allocation1 + $0x8] sm:$0xff pattern:$0x75316420]  ;;  %v565_v63 = vld.sshfl [vmem:[#allocation1] sm:$0xff pattern:$0x75316420] }
  0xd6   : > { %572 = vrot.lane.b32.xlu0 %v567_v61, %s906_s30  ;;  %570 = vrot.lane.b32.xlu2 %v566_v62, %s906_s30 }
  0xd7   : > { %568 = vrot.lane.b32.xlu1 %v565_v63, %s906_s30 }
  0xde   : > { %608 = vperm.xlu0 %849, %v805_v0   ;;  %595 = vperm.xlu2 %851, %v592_v1  }
  0xdf   : > { %585 = vperm.xlu1 %850, %v804_v2  }
  0xe6   : > { %646 = vperm.xlu0 %849, %v643_v3   ;;  %634 = vperm.xlu2 %851, %v807_v4  }
  0xe7   : > { %621 = vperm.xlu1 %850, %v806_v5  }
  0xf8   : > { %v336_v9 = vpop.permute.xlu2 %335 }
 0x100   : > { %v361_v14 = vpop.permute.xlu2 %360 }
 0x108   : > { %v397_v23 = vpop.permute.xlu2 %396 }
 0x109   : > { %v338_v13 = vpop.permute.xlu1 %337 }
 0x10a   : > { %v341_v33 = vsel %vm339_vm8, %v336_v9, %v338_v13 }
 0x10b   : > { %v345_v40 = vadd.f32 %v341_v33, %v307_v35 }
 0x110   : > { %v442_v44 = vpop.permute.xlu2 %441 }
 0x111   : > { %v334_v20 = vpop.permute.xlu1 %333 }
 0x112   : > { %v340_v29 = vsel %vm339_vm8, %v334_v20, %v336_v9 }
 0x113   : > { %v344_v25 = vadd.f32 %v340_v29, %v306_v32 }
 0x118   : > { %v363_v30 = vpop.permute.xlu0 %362  ;;  %v465_v56 = vpop.permute.xlu2 %464 }
 0x119   : > { %v367_v34 = vsel %vm366_vm9, %v361_v14, %v363_v30  ;;  %v365_v24 = vpop.permute.xlu1 %364 }
 0x11a   : > { %v371_v36 = vsel %vm1044_vm10, %v367_v34, 0.0  ;;  %v368_v37 = vsel %vm366_vm9, %v363_v30, %v365_v24 }
 0x11b   : > { %v380_v38 = vmul.f32 %v378_v6, %v371_v36  ;;  %v372_v39 = vsel %vm1048_vm11, %v368_v37, 0.0 }
 0x11c   : > { %v381_v41 = vmul.f32 %v378_v6, %v372_v39 }
 0x11d   : > { %v382_v42 = vadd.f32 %v380_v38, %v344_v25 }
 0x11e   : > { %v383_v43 = vadd.f32 %v381_v41, %v345_v40 }
 0x120   : > { %v399_v45 = vpop.permute.xlu0 %398  ;;  %v503_v1 = vpop.permute.xlu2 %502 }
 0x121   : > { %v402_v46 = vsel %vm400_vm12, %v397_v23, %v399_v45  ;;  %v395_v47 = vpop.permute.xlu1 %394 }
 0x122   : > { %v406_v48 = vsel %vm1034_vm7, %v402_v46, 0.0  ;;  %v401_v49 = vsel %vm400_vm12, %v395_v47, %v397_v23 }
 0x123   : > { %v415_v50 = vmul.f32 %v412_v10, %v406_v48  ;;  %v405_v51 = vsel %vm1030_vm6, %v401_v49, 0.0 }
 0x124   : > { %v414_v52 = vmul.f32 %v412_v10, %v405_v51 }
 0x125   : > { %v417_v53 = vadd.f32 %v415_v50, %v383_v43 }
 0x126   : > { %v416_v54 = vadd.f32 %v414_v52, %v382_v42 }
 0x128   : > { %v444_v55 = vpop.permute.xlu0 %443  ;;  %v548_v12 = vpop.permute.xlu2 %547 }
 0x129   : > { %v446_v57 = vpop.permute.xlu1 %445  ;;  %v448_v58 = vsel %vm447_vm13, %v442_v44, %v444_v55 }
 0x12a   : > { %v449_v60 = vsel %vm447_vm13, %v444_v55, %v446_v57  ;;  %v452_v2 = vadd.f32 %v448_v58, %v416_v54 }
 0x12b   : > { %v453_v5 = vadd.f32 %v449_v60, %v417_v53 }
 0x130   : > { %v467_v59 = vpop.permute.xlu0 %466  ;;  %v571_v18 = vpop.permute.xlu2 %570 }
 0x131   : > { %v471_v61 = vsel %vm470_vm14, %v465_v56, %v467_v59  ;;  %v469_v62 = vpop.permute.xlu1 %468 }
 0x132   : > { %v475_v63 = vsel %vm1044_vm10, %v471_v61, 0.0  ;;  %v472_v0 = vsel %vm470_vm14, %v467_v59, %v469_v62 }
 0x133   : > { %v484_v3 = vmul.f32 %v1026_v8, %v475_v63  ;;  %v476_v4 = vsel %vm1048_vm11, %v472_v0, 0.0 }
 0x134   : > { %v485_v6 = vmul.f32 %v1026_v8, %v476_v4 }
 0x135   : > { %v486_v7 = vadd.f32 %v484_v3, %v452_v2 }
 0x136   : > { %v487_v9 = vadd.f32 %v485_v6, %v453_v5 }
 0x138   : > { %v499_v10 = vpop.permute.xlu0 %498  ;;  %v596_v36 = vpop.permute.xlu2 %595 }
 0x139   : > { %v501_v11 = vpop.permute.xlu1 %500 }
 0x13a   : > { %v505_v15 = vsel %vm504_vm15, %v499_v10, %v501_v11  ;;  %v506_v17 = vsel %vm504_vm15, %v501_v11, %v503_v1 }
 0x13b   : > { %v509_v20 = vsel %vm1030_vm6, %v505_v15, 0.0  ;;  %v510_v23 = vsel %vm1034_vm7, %v506_v17, 0.0 }
 0x13c   : > { %v518_v27 = vmul.f32 %v1028_v19, %v509_v20  ;;  %v519_v29 = vmul.f32 %v1028_v19, %v510_v23 }
 0x13e   : > { %v521_v24 = vadd.f32 %v519_v29, %v487_v9  ;;  %v520_v35 = vadd.f32 %v518_v27, %v486_v7 }
 0x140   : > { %v550_v13 = vpop.permute.xlu0 %549  ;;  %v635_v58 = vpop.permute.xlu2 %634 }
 0x141   : > { %v546_v14 = vpop.permute.xlu1 %545  ;;  %v553_v33 = vsel %vm551_vm1, %v548_v12, %v550_v13 }
 0x142   : > { %v552_v34 = vsel %vm551_vm1, %v546_v14, %v548_v12  ;;  %v557_v25 = vadd.f32 %v553_v33, %v521_v24 }
 0x143   : > { %v556_v38 = vadd.f32 %v552_v34, %v520_v35 }
 0x148   : > { %v573_v8 = vpop.permute.xlu0 %572 }
 0x149   : > { %v569_v26 = vpop.permute.xlu1 %568  ;;  %v576_v30 = vsel %vm574_vm0, %v571_v18, %v573_v8 }
 0x14a   : > { %v575_v32 = vsel %vm574_vm0, %v569_v26, %v571_v18  ;;  %v580_v37 = vsel %vm1048_vm11, %v576_v30, 0.0 }
 0x14b   : > { %v579_v21 = vsel %vm1044_vm10, %v575_v32, 0.0 }
 0x150   : > { %v609_v42 = vpop.permute.xlu0 %608 }
 0x151   : > { %v586_v22 = vpop.permute.xlu1 %585 }
 0x152   : > { %v588_v39 = vmul.f32 %v586_v22, %v579_v21  ;;  %v589_v40 = vmul.f32 %v586_v22, %v580_v37 }
 0x154   : > { %v590_v19 = vadd.f32 %v588_v39, %v556_v38  ;;  %v591_v41 = vadd.f32 %v589_v40, %v557_v25 }
 0x156   : > { %v598_v43 = vperm.slane %v590_v19, 0  ;;  %v599_v44 = vperm.slane %v591_v41, 0  ;;  %v611_v45 = vperm.slane %v590_v19, 1  ;;  %v612_v46 = vperm.slane %v591_v41, 1 }
 0x157   : > { %v624_v47 = vperm.slane %v590_v19, 2  ;;  %v625_v48 = vperm.slane %v591_v41, 2  ;;  %v637_v49 = vperm.slane %v590_v19, 3  ;;  %v638_v28 = vperm.slane %v591_v41, 3 }
 0x158   : > { %v600_v50 = vmul.f32 %v598_v43, %v596_v36  ;;  %v601_v51 = vmul.f32 %v599_v44, %v596_v36  ;;  %v613_v52 = vmul.f32 %v611_v45, %v609_v42  ;;  %v614_v31 = vmul.f32 %v612_v46, %v609_v42  ;;  %v647_v1 = vpop.permute.xlu0 %646 }
 0x159   : > { %v622_v53 = vpop.permute.xlu1 %621  ;;  %v639_v61 = vmul.f32 %v637_v49, %v635_v58  ;;  %v640_v62 = vmul.f32 %v638_v28, %v635_v58 }
 0x15a   : > { %v615_v54 = vadd.f32 %v613_v52, %v600_v50  ;;  %v616_v55 = vadd.f32 %v614_v31, %v601_v51  ;;  %v626_v56 = vmul.f32 %v624_v47, %v622_v53  ;;  %v627_v57 = vmul.f32 %v625_v48, %v622_v53 }
 0x15c   : > { %v628_v59 = vadd.f32 %v626_v56, %v615_v54  ;;  %v629_v60 = vadd.f32 %v627_v57, %v616_v55  ;;  %654 = sbr.rel (%p808_p4) target bundleno = 356 (0x164), region = 48 }
 0x15e   : > { %v641_v63 = vadd.f32 %v639_v61, %v628_v59  ;;  %v642_v0 = vadd.f32 %v640_v62, %v629_v60 }
 0x160   : > { %v649_v2 = vadd.f32 %v647_v1, %v641_v63  ;;  %v650_v3 = vadd.f32 %v647_v1, %v642_v0 }
 0x161   : > { %vm655_vm2 = vcmask 3072   ;;  %v907_v4 = vmov 0.0  }
 0x162   : > { %656 = vst.msk [vmem:[#allocation4] sm:$0xf] %vm655_vm2, %v907_v4 }
 0x163   : > { %657 = vst.msk [vmem:[#allocation5] sm:$0xf] %vm655_vm2, %v907_v4 }
 0x164 PF: > { %vm661_vm3 = vcmask 1043456   ;;  %s817_s19 = sshll.u32 %s953_s22, 3  ;;  %v660_v5 = vrot.slane %v650_v3, 4  ;;  %v678_v9 = vmul.f32 %v649_v2, %v649_v2  ;;  %v679_v10 = vmul.f32 %v650_v3, %v650_v3  ;;  %p811_p5 = scmp.ne.s32.totalorder %s953_s22, 1 }
 0x165   : > { %v669_v6 = vsel %vm661_vm3, %v649_v2, 0.0  ;;  %v670_v7 = vsel %vm661_vm3, %v650_v3, 0.0  ;;  %s666_s20 = scalar_lea.vmem [#allocation3], %s817_s19  ;;  %vm675_vm4 = vcmask 3072  }
 0x166   : > { %v671_v11 = vadd.f32 %v670_v7, %v669_v6  ;;  %v662_v12 = vsel %vm661_vm3, %v649_v2, %v660_v5  ;;  %v680_v13 = vsel %vm661_vm3, %v678_v9, 0.0  ;;  %v681_v14 = vsel %vm661_vm3, %v679_v10, 0.0 }
 0x167   : > { %667 = vst [vmem:[%s666_s20] sm:$0xff] %v662_v12  ;;  %v682_v15 = vadd.f32 %v681_v14, %v680_v13 }
 0x168   : > { %672 = vadd.xlane.f32.xlu0 %v671_v11 }
 0x169   : > { %v668_v17 = vld [vmem:[#allocation4] sm:$0xf] }
 0x16a   : > { %v677_v23 = vld [vmem:[#allocation5] sm:$0xf] }
 0x170   : > { %683 = vadd.xlane.f32.xlu0 %v682_v15 }
 0x1db   : > { %v673_v18 = vpop.xlane.xlu0 %672 }
 0x1dc   : > { %v674_v20 = vadd.f32 %v673_v18, %v668_v17 }
 0x1de   : > { %676 = vst.msk [vmem:[#allocation4] sm:$0xf] %vm675_vm4, %v674_v20 }
 0x1e2   : > { %690 = sbr.rel (%p811_p5) target bundleno = 649 (0x289), region = 52 }
 0x1e3   : > { %v684_v26 = vpop.xlane.xlu0 %683 }
 0x1e4   : > { %v685_v8 = vadd.f32 %v684_v26, %v677_v23 }
 0x1e6   : > { %686 = vst.msk [vmem:[#allocation5] sm:$0xf] %vm675_vm4, %v685_v8 }
 0x1e7   : > { %v691_v27 = vld [vmem:[#allocation4] sm:$0xf]  ;;  %v908_v30 = vmov 0   ;;  %v697_v38 = vld [vmem:[%s1098_s4] sm:$0xf]  ;;  %v713_v46 = vld [vmem:[#allocation3] sm:$0xff] }
 0x1e8   : > { %852 = vset.pattern.permute.xlu0 %v908_v30  ;;  %v692_v32 = vmul.f32 0.001953125, %v691_v27  ;;  %v710_v42 = vld [vmem:[%s1099_s5] sm:$0xf] }
 0x1e9   : > { %v714_v47 = vld [vmem:[#allocation3 + $0x8] sm:$0xff] }
 0x1ea   : > { %v695_v34 = vmul.f32 %v692_v32, %v692_v32 }
 0x1ed   : > { %v693_v29 = vld [vmem:[#allocation5] sm:$0xf] }
 0x1ee   : > { %v694_v33 = vmul.f32 0.001953125, %v693_v29 }
 0x1f0   : > { %v696_v24 = vsub.f32 %v694_v33, %v695_v34 }
 0x1f2   : > { %v698_v35 = vadd.f32 0.001, %v696_v24 }
 0x1f4   : > { %853 = vrsqrt.f32 %v698_v35  ;;  %vm705_vm5 = vweird.f32 %v698_v35 }
 0x1fa   : > { %v854_v36 = vpop.eup %853 }
 0x1fb   : > { %v700_v21 = vmul.f32 %v854_v36, %v698_v35  ;;  %vm706_vm6 = vweird.f32 %v854_v36 }
 0x1fc   : > { %vm707_vm7 = vmor %vm705_vm5, %vm706_vm6 }
 0x1fd   : > { %v701_v22 = vmul.f32 %v854_v36, %v700_v21 }
 0x1ff   : > { %v702_v37 = vmul.f32 0.5, %v701_v22 }
 0x201   : > { %v703_v25 = vsub.f32 1.5, %v702_v37 }
 0x203   : > { %v704_v39 = vmul.f32 %v854_v36, %v703_v25 }
 0x205   : > { %v708_v40 = vsel %vm707_vm7, %v854_v36, %v704_v39 }
 0x206   : > { %v709_v19 = vmul.f32 %v708_v40, %v697_v38 }
 0x208   : > { %717 = vperm.xlu0 %852, %v709_v19   ;;  %v711_v41 = vmul.f32 %v709_v19, %v692_v32 }
 0x20a   : > { %v712_v43 = vsub.f32 %v710_v42, %v711_v41 }
 0x210   : > { %728 = vperm.xlu0 %852, %v712_v43  }
 0x27a   : > { %v718_v44 = vpop.permute.xlu0 %717 }
 0x27b   : > { %v722_v45 = vperm.slane %v718_v44, %v988_v16 }
 0x27d   : > { %v724_v49 = vmul.f32 %v722_v45, %v713_v46  ;;  %v725_v28 = vmul.f32 %v722_v45, %v714_v47 }
 0x282   : > { %v729_v48 = vpop.permute.xlu0 %728 }
 0x283   : > { %v733_v50 = vperm.slane %v729_v48, %v988_v16 }
 0x285   : > { %v735_v51 = vadd.f32 %v733_v50, %v724_v49  ;;  %v736_v52 = vadd.f32 %v733_v50, %v725_v28 }
 0x287   : > { %737 = vst [vmem:[#allocation6] sm:$0xff] %v735_v51 }
 0x288   : > { %738 = vst [vmem:[#allocation6 + $0x8] sm:$0xff] %v736_v52 }
 0x289 PF: > { %p822_p6 = scmp.eq.s32.totalorder %s953_s22, 1  ;;  %s909_s27 = smov [#allocation6]  }
 0x28a   : > { %s744_s28 = sshll.u32 %s909_s27, 4  ;;  %s746_s7 = sshll.u32 %s1100_s6, 4  ;;  %s745_s28 = int_to_ptr.vmem [resolvable:$true] %s744_s28  ;;  %s747_s7 = int_to_ptr.hbm [resolvable:$true] %s746_s7 }
 0x28b   : > { %s910_s8 = smov 128   ;;  %s911_s9 = smov 8  }
 0x28c   : > { %819 = dma.vmem_to_hbm [thread:$0]  (%p822_p6), %s745_s28, 256, %s747_s7, [#allocation7], %s910_s8, %s910_s8, %s911_s9  }
 0x28d   : > { %888 = dma.done.wait (%p822_p6), [#allocation7], 256  }
 0x28e   : > { %890 = vsyncadd (%p822_p6), [#allocation7], 4294967040 }
 0x28f PF: > { %s17_s21 = sadd.s32 1, %s893_s21  }
 0x290   : > { %p14_p7 = scmp.ge.s32.totalorder %s17_s21, 4  }
 0x292   :  { %16 = sbr.rel (!%p14_p7) target bundleno = 1 (0x1), region = 99 }
 0x297   :  { %763 = vsyncpa [#allocation7], 1 }
 0x298   :  { %765 = vsyncpa [#allocation7 + $0x1], 1 }

</bundles_post_ra>
